<compile_context>
chip_gen: v5e
topology: v5e:2x2
jax: 0.10.0
libtpu: 0.0.40
codegen_flags: <defaults>
</compile_context>

<pallas_src>
import jax
import jax.numpy as jnp
from jax.experimental import pallas as pl
from jax.experimental.pallas import tpu as pltpu


def birnn_kernel(x_ref, h0_ref, wih_ref, b_ref, whh_ref, wfc_ref, bfc_ref,
                 y_ref, hout_ref,
                 z_ref, h_all_ref):
    N = h0_ref.shape[0]
    H2 = h0_ref.shape[1]          # 2*H (both directions fused along lanes)
    H = H2 // 2
    LN = x_ref.shape[0]
    L = LN // N

    # ---- Hoisted fused input projection (both directions, one MXU pass). ----
    # z[:, :H]  = x[:, t]     @ Wih_f^T + (b_ih_f + b_hh_f)   at row block t
    # z[:, H:]  = x[:, t]     @ Wih_b^T + (b_ih_b + b_hh_b)   at row block t
    z_ref[...] = (jnp.dot(x_ref[...], wih_ref[...],
                          preferred_element_type=jnp.float32) + b_ref[...])

    whh = whh_ref[...]            # bf16 (2H, 2H) block-diagonal
    # Lane mask selecting the forward half; hoisted out of the loop (broadcasts
    # are not CSE'd by JAX).
    lane = jax.lax.broadcasted_iota(jnp.int32, (N, H2), dimension=1)
    fwd_mask = lane < H

    h_lo = h0_ref[...]                       # combined [hf | hb], MXU dtype
    h_f32 = h_lo.astype(jnp.float32)

    # ---- Serial recurrence: one matmul + one add + one tanh + one store. ----
    # Static unroll; L is small here (see TODO for long L).
    for t in range(L):
        zf = z_ref[pl.ds(t * N, N), :]               # forward half valid [:, :H]
        zb = z_ref[pl.ds((L - 1 - t) * N, N), :]     # backward half valid [:, H:]
        z_t = jnp.where(fwd_mask, zf, zb)            # one VPU select, no concat
        rec = jnp.dot(h_lo, whh, preferred_element_type=jnp.float32)
        h_f32 = jnp.tanh(z_t + rec)
        h_lo = h_f32.astype(h_all_ref.dtype)
        h_all_ref[pl.ds(t * N, N), :] = h_lo

    # ---- Deferred output Linear (block-diag Wfc): one matmul, one store. ----
    y_ref[...] = (jnp.dot(h_all_ref[...], wfc_ref[...],
                          preferred_element_type=jnp.float32) + bfc_ref[...])

    # Final combined hidden state, written exactly once (full f32 precision).
    hout_ref[...] = h_f32


def birnn_forward(x, h0, params, *, mxu_dtype=jnp.bfloat16):
    """x: (N, L, D) f32, h0: (2, N, H) f32. Returns (y (N,L,2H), h (2,N,H))."""
    N, L, D = x.shape
    H = params["w_hh_f"].shape[0]

    # Time-major flattened input, cast once to the MXU dtype.
    x_flat = jnp.transpose(x, (1, 0, 2)).reshape(L * N, D).astype(mxu_dtype)
    h0_comb = jnp.concatenate([h0[0], h0[1]], axis=-1).astype(mxu_dtype)  # (N, 2H)

    # Fused / block-diagonal weights (pre-transposed so kernel computes x @ W).
    wih_comb = jnp.concatenate([params["w_ih_f"].T,
                                params["w_ih_b"].T], axis=1).astype(mxu_dtype)  # (D, 2H)
    b_comb = jnp.concatenate([params["b_ih_f"] + params["b_hh_f"],
                              params["b_ih_b"] + params["b_hh_b"]]).reshape(1, 2 * H)
    zhh = jnp.zeros((H, H), jnp.float32)
    whh_bd = jnp.block([[params["w_hh_f"].T, zhh],
                        [zhh, params["w_hh_b"].T]]).astype(mxu_dtype)            # (2H, 2H)
    wfc_bd = jnp.block([[params["w_fc_f"].T, zhh],
                        [zhh, params["w_fc_b"].T]]).astype(mxu_dtype)            # (2H, 2H)
    bfc_comb = jnp.concatenate([params["b_fc_f"], params["b_fc_b"]]).reshape(1, 2 * H)

    vmem = pl.BlockSpec(memory_space=pltpu.MemorySpace.VMEM)

    y_flat, hout = pl.pallas_call(
        birnn_kernel,
        out_shape=[jax.ShapeDtypeStruct((L * N, 2 * H), jnp.float32),
                   jax.ShapeDtypeStruct((N, 2 * H), jnp.float32)],
        in_specs=[vmem] * 7,
        out_specs=[vmem, vmem],
        scratch_shapes=[pltpu.VMEM((L * N, 2 * H), jnp.float32),  # fused z
                        pltpu.VMEM((L * N, 2 * H), mxu_dtype)],   # fused h_all
        compiler_params=pltpu.CompilerParams(
            vmem_limit_bytes=32 * 1024 * 1024),
    )(x_flat, h0_comb, wih_comb, b_comb, whh_bd, wfc_bd, bfc_comb)

    # (L*N, 2H) -> (N, L, 2H); row t*N+n is (time t, batch n).
    y = jnp.transpose(y_flat.reshape(L, N, 2 * H), (1, 0, 2))
    h = jnp.stack([hout[:, :H], hout[:, H:]], axis=0)
    return y, h


def birnn_reference(x, h0, p):
    """Pure-JAX f32 mirror of the PyTorch forward (correctness check)."""
    N, L, D = x.shape
    hf, hb = h0[0], h0[1]
    xr = x[:, ::-1, :]
    yf_list, yb_list = [], []
    for i in range(L):
        hf = jnp.tanh(x[:, i] @ p["w_ih_f"].T + p["b_ih_f"]
                      + hf @ p["w_hh_f"].T + p["b_hh_f"])
        yf_list.append(hf @ p["w_fc_f"].T + p["b_fc_f"])
        hb = jnp.tanh(xr[:, i] @ p["w_ih_b"].T + p["b_ih_b"]
                      + hb @ p["w_hh_b"].T + p["b_hh_b"])
        yb_list.append(hb @ p["w_fc_b"].T + p["b_fc_b"])
    yf = jnp.stack(yf_list, axis=1)
    yb = jnp.stack(yb_list, axis=1)
    return jnp.concatenate([yf, yb], axis=-1), jnp.stack([hf, hb])


if __name__ == "__main__":
    N, L, D, H = 2, 8, 16, 32

    key = jax.random.PRNGKey(0)
    keys = jax.random.split(key, 14)
    scale = 1.0 / jnp.sqrt(jnp.float32(H))

    def u(k, shape):
        return jax.random.uniform(k, shape, jnp.float32, -scale, scale)

    params = {
        "w_ih_f": u(keys[0], (H, D)), "w_hh_f": u(keys[1], (H, H)),
        "b_ih_f": u(keys[2], (H,)),   "b_hh_f": u(keys[3], (H,)),
        "w_fc_f": u(keys[4], (H, H)), "b_fc_f": u(keys[5], (H,)),
        "w_ih_b": u(keys[6], (H, D)), "w_hh_b": u(keys[7], (H, H)),
        "b_ih_b": u(keys[8], (H,)),   "b_hh_b": u(keys[9], (H,)),
        "w_fc_b": u(keys[10], (H, H)), "b_fc_b": u(keys[11], (H,)),
    }

    x = jax.random.normal(keys[12], (N, L, D), jnp.float32)
    h0 = jnp.zeros((2, N, H), jnp.float32)   # matches h=None in PyTorch forward

    y, h = birnn_forward(x, h0, params)
    jax.block_until_ready((y, h))

    y_ref, h_ref = birnn_reference(x, h0, params)
    assert y.shape == (N, L, 2 * H) and h.shape == (2, N, H)
    # Tolerance loosened for bf16 MXU operands (f32 accumulation); real bugs
    # (e.g. wrong time ordering) produce O(0.3) errors and are still caught.
    assert jnp.allclose(y, y_ref, atol=3e-2, rtol=3e-2)
    assert jnp.allclose(h, h_ref, atol=3e-2, rtol=3e-2)

    print("KERNEL_OK")
</pallas_src>

<mosaic_0001>
module attributes {stable_mosaic.version = 11 : i64} {
  func.func @birnn_kernel(%arg0: memref<16x16xbf16, #tpu.memory_space<vmem>>, %arg1: memref<2x64xbf16, #tpu.memory_space<vmem>>, %arg2: memref<16x64xbf16, #tpu.memory_space<vmem>>, %arg3: memref<1x64xf32, #tpu.memory_space<vmem>>, %arg4: memref<64x64xbf16, #tpu.memory_space<vmem>>, %arg5: memref<64x64xbf16, #tpu.memory_space<vmem>>, %arg6: memref<1x64xf32, #tpu.memory_space<vmem>>, %arg7: memref<16x64xf32, #tpu.memory_space<vmem>>, %arg8: memref<2x64xf32, #tpu.memory_space<vmem>>, %arg9: memref<16x64xf32, #tpu.memory_space<vmem>>, %arg10: memref<16x64xbf16, #tpu.memory_space<vmem>>) attributes {dimension_semantics = [], scalar_prefetch = 0 : i64, scratch_operands = 2 : i64, tpu.core_type = #tpu.core_type<tc>} {
    %c0 = arith.constant 0 : index
    %c0_0 = arith.constant 0 : index
    %0 = vector.load %arg0[%c0, %c0_0] : memref<16x16xbf16, #tpu.memory_space<vmem>>, vector<16x16xbf16>
    %c0_1 = arith.constant 0 : index
    %c0_2 = arith.constant 0 : index
    %1 = vector.load %arg2[%c0_1, %c0_2] : memref<16x64xbf16, #tpu.memory_space<vmem>>, vector<16x64xbf16>
    %cst = arith.constant dense<0.000000e+00> : vector<16x64xf32>
    %2 = tpu.matmul %0, %1, %cst {dimension_numbers = #tpu.dot_dimension_numbers<[1], [0], [0], [1], [0, 0, 1, 1], [], []>} : vector<16x16xbf16>, vector<16x64xbf16>, vector<16x64xf32> -> vector<16x64xf32>
    %c0_3 = arith.constant 0 : index
    %c0_4 = arith.constant 0 : index
    %3 = vector.load %arg3[%c0_3, %c0_4] : memref<1x64xf32, #tpu.memory_space<vmem>>, vector<1x64xf32>
    %4 = vector.broadcast %3 : vector<1x64xf32> to vector<16x64xf32>
    %5 = arith.addf %2, %4 : vector<16x64xf32>
    %c0_5 = arith.constant 0 : index
    %c0_6 = arith.constant 0 : index
    %6 = vector.load %arg9[%c0_5, %c0_6] : memref<16x64xf32, #tpu.memory_space<vmem>>, vector<16x64xf32>
    tpu.vector_store %arg9[%c0_5, %c0_6], %5 {strides = array<i32>} : memref<16x64xf32, #tpu.memory_space<vmem>>, vector<16x64xf32>,
    %c0_7 = arith.constant 0 : index
    %c0_8 = arith.constant 0 : index
    %7 = vector.load %arg4[%c0_7, %c0_8] : memref<64x64xbf16, #tpu.memory_space<vmem>>, vector<64x64xbf16>
    %8 = tpu.iota {dimensions = array<i32: 1>} : vector<2x64xi32>
    %c32_i32 = arith.constant 32 : i32
    %9 = vector.broadcast %c32_i32 : i32 to vector<2x64xi32>
    %10 = arith.cmpi slt, %8, %9 : vector<2x64xi32>
    %c0_9 = arith.constant 0 : index
    %c0_10 = arith.constant 0 : index
    %11 = vector.load %arg1[%c0_9, %c0_10] : memref<2x64xbf16, #tpu.memory_space<vmem>>, vector<2x64xbf16>
    %c0_11 = arith.constant 0 : index
    %c0_12 = arith.constant 0 : index
    %12 = vector.load %arg9[%c0_11, %c0_12] : memref<16x64xf32, #tpu.memory_space<vmem>>, vector<2x64xf32>
    %c14 = arith.constant 14 : index
    %c0_13 = arith.constant 0 : index
    %13 = vector.load %arg9[%c14, %c0_13] : memref<16x64xf32, #tpu.memory_space<vmem>>, vector<2x64xf32>
    %14 = arith.select %10, %12, %13 : vector<2x64xi1>, vector<2x64xf32>
    %cst_14 = arith.constant dense<0.000000e+00> : vector<2x64xf32>
    %15 = tpu.matmul %11, %7, %cst_14 {dimension_numbers = #tpu.dot_dimension_numbers<[1], [0], [0], [1], [0, 0, 1, 1], [], []>} : vector<2x64xbf16>, vector<64x64xbf16>, vector<2x64xf32> -> vector<2x64xf32>
    %16 = arith.addf %14, %15 : vector<2x64xf32>
    %17 = math.tanh %16 : vector<2x64xf32>
    %18 = arith.truncf %17 : vector<2x64xf32> to vector<2x64xbf16>
    %c0_15 = arith.constant 0 : index
    %c0_16 = arith.constant 0 : index
    %19 = vector.load %arg10[%c0_15, %c0_16] : memref<16x64xbf16, #tpu.memory_space<vmem>>, vector<2x64xbf16>
    tpu.vector_store %arg10[%c0_15, %c0_16], %18 {strides = array<i32>} : memref<16x64xbf16, #tpu.memory_space<vmem>>, vector<2x64xbf16>,
    %c2 = arith.constant 2 : index
    %c0_17 = arith.constant 0 : index
    %20 = vector.load %arg9[%c2, %c0_17] : memref<16x64xf32, #tpu.memory_space<vmem>>, vector<2x64xf32>
    %c12 = arith.constant 12 : index
    %c0_18 = arith.constant 0 : index
    %21 = vector.load %arg9[%c12, %c0_18] : memref<16x64xf32, #tpu.memory_space<vmem>>, vector<2x64xf32>
    %22 = arith.select %10, %20, %21 : vector<2x64xi1>, vector<2x64xf32>
    %cst_19 = arith.constant dense<0.000000e+00> : vector<2x64xf32>
    %23 = tpu.matmul %18, %7, %cst_19 {dimension_numbers = #tpu.dot_dimension_numbers<[1], [0], [0], [1], [0, 0, 1, 1], [], []>} : vector<2x64xbf16>, vector<64x64xbf16>, vector<2x64xf32> -> vector<2x64xf32>
    %24 = arith.addf %22, %23 : vector<2x64xf32>
    %25 = math.tanh %24 : vector<2x64xf32>
    %26 = arith.truncf %25 : vector<2x64xf32> to vector<2x64xbf16>
    %c2_20 = arith.constant 2 : index
    %c0_21 = arith.constant 0 : index
    %27 = vector.load %arg10[%c2_20, %c0_21] : memref<16x64xbf16, #tpu.memory_space<vmem>>, vector<2x64xbf16>
    tpu.vector_store %arg10[%c2_20, %c0_21], %26 {strides = array<i32>} : memref<16x64xbf16, #tpu.memory_space<vmem>>, vector<2x64xbf16>,
    %c4 = arith.constant 4 : index
    %c0_22 = arith.constant 0 : index
    %28 = vector.load %arg9[%c4, %c0_22] : memref<16x64xf32, #tpu.memory_space<vmem>>, vector<2x64xf32>
    %c10 = arith.constant 10 : index
    %c0_23 = arith.constant 0 : index
    %29 = vector.load %arg9[%c10, %c0_23] : memref<16x64xf32, #tpu.memory_space<vmem>>, vector<2x64xf32>
    %30 = arith.select %10, %28, %29 : vector<2x64xi1>, vector<2x64xf32>
    %cst_24 = arith.constant dense<0.000000e+00> : vector<2x64xf32>
    %31 = tpu.matmul %26, %7, %cst_24 {dimension_numbers = #tpu.dot_dimension_numbers<[1], [0], [0], [1], [0, 0, 1, 1], [], []>} : vector<2x64xbf16>, vector<64x64xbf16>, vector<2x64xf32> -> vector<2x64xf32>
    %32 = arith.addf %30, %31 : vector<2x64xf32>
    %33 = math.tanh %32 : vector<2x64xf32>
    %34 = arith.truncf %33 : vector<2x64xf32> to vector<2x64xbf16>
    %c4_25 = arith.constant 4 : index
    %c0_26 = arith.constant 0 : index
    %35 = vector.load %arg10[%c4_25, %c0_26] : memref<16x64xbf16, #tpu.memory_space<vmem>>, vector<2x64xbf16>
    tpu.vector_store %arg10[%c4_25, %c0_26], %34 {strides = array<i32>} : memref<16x64xbf16, #tpu.memory_space<vmem>>, vector<2x64xbf16>,
    %c6 = arith.constant 6 : index
    %c0_27 = arith.constant 0 : index
    %36 = vector.load %arg9[%c6, %c0_27] : memref<16x64xf32, #tpu.memory_space<vmem>>, vector<2x64xf32>
    %c8 = arith.constant 8 : index
    %c0_28 = arith.constant 0 : index
    %37 = vector.load %arg9[%c8, %c0_28] : memref<16x64xf32, #tpu.memory_space<vmem>>, vector<2x64xf32>
    %38 = arith.select %10, %36, %37 : vector<2x64xi1>, vector<2x64xf32>
    %cst_29 = arith.constant dense<0.000000e+00> : vector<2x64xf32>
    %39 = tpu.matmul %34, %7, %cst_29 {dimension_numbers = #tpu.dot_dimension_numbers<[1], [0], [0], [1], [0, 0, 1, 1], [], []>} : vector<2x64xbf16>, vector<64x64xbf16>, vector<2x64xf32> -> vector<2x64xf32>
    %40 = arith.addf %38, %39 : vector<2x64xf32>
    %41 = math.tanh %40 : vector<2x64xf32>
    %42 = arith.truncf %41 : vector<2x64xf32> to vector<2x64xbf16>
    %c6_30 = arith.constant 6 : index
    %c0_31 = arith.constant 0 : index
    %43 = vector.load %arg10[%c6_30, %c0_31] : memref<16x64xbf16, #tpu.memory_space<vmem>>, vector<2x64xbf16>
    tpu.vector_store %arg10[%c6_30, %c0_31], %42 {strides = array<i32>} : memref<16x64xbf16, #tpu.memory_space<vmem>>, vector<2x64xbf16>,
    %c8_32 = arith.constant 8 : index
    %c0_33 = arith.constant 0 : index
    %44 = vector.load %arg9[%c8_32, %c0_33] : memref<16x64xf32, #tpu.memory_space<vmem>>, vector<2x64xf32>
    %c6_34 = arith.constant 6 : index
    %c0_35 = arith.constant 0 : index
    %45 = vector.load %arg9[%c6_34, %c0_35] : memref<16x64xf32, #tpu.memory_space<vmem>>, vector<2x64xf32>
    %46 = arith.select %10, %44, %45 : vector<2x64xi1>, vector<2x64xf32>
    %cst_36 = arith.constant dense<0.000000e+00> : vector<2x64xf32>
    %47 = tpu.matmul %42, %7, %cst_36 {dimension_numbers = #tpu.dot_dimension_numbers<[1], [0], [0], [1], [0, 0, 1, 1], [], []>} : vector<2x64xbf16>, vector<64x64xbf16>, vector<2x64xf32> -> vector<2x64xf32>
    %48 = arith.addf %46, %47 : vector<2x64xf32>
    %49 = math.tanh %48 : vector<2x64xf32>
    %50 = arith.truncf %49 : vector<2x64xf32> to vector<2x64xbf16>
    %c8_37 = arith.constant 8 : index
    %c0_38 = arith.constant 0 : index
    %51 = vector.load %arg10[%c8_37, %c0_38] : memref<16x64xbf16, #tpu.memory_space<vmem>>, vector<2x64xbf16>
    tpu.vector_store %arg10[%c8_37, %c0_38], %50 {strides = array<i32>} : memref<16x64xbf16, #tpu.memory_space<vmem>>, vector<2x64xbf16>,
    %c10_39 = arith.constant 10 : index
    %c0_40 = arith.constant 0 : index
    %52 = vector.load %arg9[%c10_39, %c0_40] : memref<16x64xf32, #tpu.memory_space<vmem>>, vector<2x64xf32>
    %c4_41 = arith.constant 4 : index
    %c0_42 = arith.constant 0 : index
    %53 = vector.load %arg9[%c4_41, %c0_42] : memref<16x64xf32, #tpu.memory_space<vmem>>, vector<2x64xf32>
    %54 = arith.select %10, %52, %53 : vector<2x64xi1>, vector<2x64xf32>
    %cst_43 = arith.constant dense<0.000000e+00> : vector<2x64xf32>
    %55 = tpu.matmul %50, %7, %cst_43 {dimension_numbers = #tpu.dot_dimension_numbers<[1], [0], [0], [1], [0, 0, 1, 1], [], []>} : vector<2x64xbf16>, vector<64x64xbf16>, vector<2x64xf32> -> vector<2x64xf32>
    %56 = arith.addf %54, %55 : vector<2x64xf32>
    %57 = math.tanh %56 : vector<2x64xf32>
    %58 = arith.truncf %57 : vector<2x64xf32> to vector<2x64xbf16>
    %c10_44 = arith.constant 10 : index
    %c0_45 = arith.constant 0 : index
    %59 = vector.load %arg10[%c10_44, %c0_45] : memref<16x64xbf16, #tpu.memory_space<vmem>>, vector<2x64xbf16>
    tpu.vector_store %arg10[%c10_44, %c0_45], %58 {strides = array<i32>} : memref<16x64xbf16, #tpu.memory_space<vmem>>, vector<2x64xbf16>,
    %c12_46 = arith.constant 12 : index
    %c0_47 = arith.constant 0 : index
    %60 = vector.load %arg9[%c12_46, %c0_47] : memref<16x64xf32, #tpu.memory_space<vmem>>, vector<2x64xf32>
    %c2_48 = arith.constant 2 : index
    %c0_49 = arith.constant 0 : index
    %61 = vector.load %arg9[%c2_48, %c0_49] : memref<16x64xf32, #tpu.memory_space<vmem>>, vector<2x64xf32>
    %62 = arith.select %10, %60, %61 : vector<2x64xi1>, vector<2x64xf32>
    %cst_50 = arith.constant dense<0.000000e+00> : vector<2x64xf32>
    %63 = tpu.matmul %58, %7, %cst_50 {dimension_numbers = #tpu.dot_dimension_numbers<[1], [0], [0], [1], [0, 0, 1, 1], [], []>} : vector<2x64xbf16>, vector<64x64xbf16>, vector<2x64xf32> -> vector<2x64xf32>
    %64 = arith.addf %62, %63 : vector<2x64xf32>
    %65 = math.tanh %64 : vector<2x64xf32>
    %66 = arith.truncf %65 : vector<2x64xf32> to vector<2x64xbf16>
    %c12_51 = arith.constant 12 : index
    %c0_52 = arith.constant 0 : index
    %67 = vector.load %arg10[%c12_51, %c0_52] : memref<16x64xbf16, #tpu.memory_space<vmem>>, vector<2x64xbf16>
    tpu.vector_store %arg10[%c12_51, %c0_52], %66 {strides = array<i32>} : memref<16x64xbf16, #tpu.memory_space<vmem>>, vector<2x64xbf16>,
    %c14_53 = arith.constant 14 : index
    %c0_54 = arith.constant 0 : index
    %68 = vector.load %arg9[%c14_53, %c0_54] : memref<16x64xf32, #tpu.memory_space<vmem>>, vector<2x64xf32>
    %c0_55 = arith.constant 0 : index
    %c0_56 = arith.constant 0 : index
    %69 = vector.load %arg9[%c0_55, %c0_56] : memref<16x64xf32, #tpu.memory_space<vmem>>, vector<2x64xf32>
    %70 = arith.select %10, %68, %69 : vector<2x64xi1>, vector<2x64xf32>
    %cst_57 = arith.constant dense<0.000000e+00> : vector<2x64xf32>
    %71 = tpu.matmul %66, %7, %cst_57 {dimension_numbers = #tpu.dot_dimension_numbers<[1], [0], [0], [1], [0, 0, 1, 1], [], []>} : vector<2x64xbf16>, vector<64x64xbf16>, vector<2x64xf32> -> vector<2x64xf32>
    %72 = arith.addf %70, %71 : vector<2x64xf32>
    %73 = math.tanh %72 : vector<2x64xf32>
    %74 = arith.truncf %73 : vector<2x64xf32> to vector<2x64xbf16>
    %c14_58 = arith.constant 14 : index
    %c0_59 = arith.constant 0 : index
    %75 = vector.load %arg10[%c14_58, %c0_59] : memref<16x64xbf16, #tpu.memory_space<vmem>>, vector<2x64xbf16>
    tpu.vector_store %arg10[%c14_58, %c0_59], %74 {strides = array<i32>} : memref<16x64xbf16, #tpu.memory_space<vmem>>, vector<2x64xbf16>,
    %c0_60 = arith.constant 0 : index
    %c0_61 = arith.constant 0 : index
    %76 = vector.load %arg10[%c0_60, %c0_61] : memref<16x64xbf16, #tpu.memory_space<vmem>>, vector<16x64xbf16>
    %c0_62 = arith.constant 0 : index
    %c0_63 = arith.constant 0 : index
    %77 = vector.load %arg5[%c0_62, %c0_63] : memref<64x64xbf16, #tpu.memory_space<vmem>>, vector<64x64xbf16>
    %cst_64 = arith.constant dense<0.000000e+00> : vector<16x64xf32>
    %78 = tpu.matmul %76, %77, %cst_64 {dimension_numbers = #tpu.dot_dimension_numbers<[1], [0], [0], [1], [0, 0, 1, 1], [], []>} : vector<16x64xbf16>, vector<64x64xbf16>, vector<16x64xf32> -> vector<16x64xf32>
    %c0_65 = arith.constant 0 : index
    %c0_66 = arith.constant 0 : index
    %79 = vector.load %arg6[%c0_65, %c0_66] : memref<1x64xf32, #tpu.memory_space<vmem>>, vector<1x64xf32>
    %80 = vector.broadcast %79 : vector<1x64xf32> to vector<16x64xf32>
    %81 = arith.addf %78, %80 : vector<16x64xf32>
    %c0_67 = arith.constant 0 : index
    %c0_68 = arith.constant 0 : index
    %82 = vector.load %arg7[%c0_67, %c0_68] : memref<16x64xf32, #tpu.memory_space<vmem>>, vector<16x64xf32>
    tpu.vector_store %arg7[%c0_67, %c0_68], %81 {strides = array<i32>} : memref<16x64xf32, #tpu.memory_space<vmem>>, vector<16x64xf32>,
    %c0_69 = arith.constant 0 : index
    %c0_70 = arith.constant 0 : index
    %83 = vector.load %arg8[%c0_69, %c0_70] : memref<2x64xf32, #tpu.memory_space<vmem>>, vector<2x64xf32>
    tpu.vector_store %arg8[%c0_69, %c0_70], %73 {strides = array<i32>} : memref<2x64xf32, #tpu.memory_space<vmem>>, vector<2x64xf32>,
    return
  }
}

</mosaic_0001>

<bundles_post_ra>
// kernel: tpu_custom_call.1
= control target key start
LH: loop header
LB: loop body
LE: loop exit
PB: predicated region body
PF: predicated region fallthrough
CT: control target
= control target key end

     0   :  { %14 = vsyncpa [#allocation5], 0  ;;  %s885_s0 = inlined_call_operand.hbm [shape: bf16[16,16], index: 0, kind: input, shape index: {}]   ;;  %s886_s1 = inlined_call_operand.hbm [shape: bf16[2,64], index: 1, kind: input, shape index: {}]   ;;  %s887_s2 = inlined_call_operand.hbm [shape: bf16[16,64], index: 2, kind: input, shape index: {}]   ;;  %s888_s3 = inlined_call_operand.vmem [shape: f32[1,64], index: 3, kind: input, shape index: {}]   ;;  %s889_s4 = inlined_call_operand.hbm [shape: bf16[64,64], index: 4, kind: input, shape index: {}]   ;;  %s890_s5 = inlined_call_operand.hbm [shape: bf16[64,64], index: 5, kind: input, shape index: {}]   ;;  %s891_s6 = inlined_call_operand.vmem [shape: f32[1,64], index: 6, kind: input, shape index: {}]   ;;  %s892_s7 = inlined_call_operand.hbm [shape: f32[16,64], index: 7, kind: output, shape index: {0}]   ;;  %s893_s8 = inlined_call_operand.hbm [shape: f32[2,64], index: 8, kind: output, shape index: {1}]  }
   0x1   :  { %15 = vsyncpa [#allocation8], 0 }
   0x2   :  { %16 = vsyncpa [#allocation11], 0 }
   0x3   :  { %17 = vsyncpa [#allocation6], 0  ;;  %s37_s29 = sshll.u32 %s886_s1, 4  ;;  %s38_s29 = int_to_ptr.hbm [resolvable:$true] %s37_s29 }
   0x4   :  { %18 = vsyncpa [#allocation15], 0  ;;  %s762_s30 = smov [#allocation7]   ;;  %s62_s12 = sshll.u32 %s889_s4, 4  ;;  %s63_s12 = int_to_ptr.hbm [resolvable:$true] %s62_s12 }
   0x5   :  { %s39_s9 = sshll.u32 %s762_s30, 4  ;;  %s763_s13 = smov [#allocation10]   ;;  %s40_s9 = int_to_ptr.vmem [resolvable:$true] %s39_s9 }
   0x6   :  { %42 = dma.hbm_to_vmem [thread:$0]  %s38_s29, 16, %s40_s9, [#allocation8]  }
   0x7   :  { %s64_s14 = sshll.u32 %s763_s13, 4  ;;  %s23_s17 = sshll.u32 %s885_s0, 4  ;;  %s65_s14 = int_to_ptr.vmem [resolvable:$true] %s64_s14  ;;  %s24_s17 = int_to_ptr.hbm [resolvable:$true] %s23_s17 }
   0x8   :  { %s764_s1 = smov 64   ;;  %s765_s18 = smov 4  }
   0x9   :  { %70 = dma.hbm_to_vmem [thread:$0]  %s63_s12, 512, %s65_s14, [#allocation11], %s764_s1, %s764_s1, %s765_s18  }
   0xa   :  { %s47_s21 = sshll.u32 %s887_s2, 4  ;;  %s766_s22 = smov [#allocation4]   ;;  %s48_s21 = int_to_ptr.hbm [resolvable:$true] %s47_s21 }
   0xb   :  { %s25_s23 = sshll.u32 %s766_s22, 4  ;;  %s767_s4 = smov [#allocation9]   ;;  %s26_s23 = int_to_ptr.vmem [resolvable:$true] %s25_s23 }
   0xc   :  { %31 = dma.hbm_to_vmem [thread:$0]  %s24_s17, 128, %s26_s23, [#allocation5], %s764_s1, %s764_s1, %s765_s18  }
   0xd   :  { %s49_s24 = sshll.u32 %s767_s4, 4  ;;  %s75_s0 = sshll.u32 %s890_s5, 4  ;;  %s50_s24 = int_to_ptr.vmem [resolvable:$true] %s49_s24  ;;  %s76_s0 = int_to_ptr.hbm [resolvable:$true] %s75_s0 }
   0xe   :  { %55 = dma.hbm_to_vmem [thread:$0]  %s48_s21, 128, %s50_s24, [#allocation8], %s764_s1, %s764_s1, %s765_s18  }
   0xf   :  { %s768_s27 = smov [#allocation12]  }
  0x10   :  { %s77_s28 = sshll.u32 %s768_s27, 4  ;;  %s78_s28 = int_to_ptr.vmem [resolvable:$true] %s77_s28 }
  0x11   :  { %83 = dma.hbm_to_vmem [thread:$0]  %s76_s0, 512, %s78_s28, [#allocation11], %s764_s1, %s764_s1, %s765_s18  }
  0x12   :  { %752 = dma.done.wait [#allocation5], 128  }
  0x13   :  { %753 = vsyncadd [#allocation5], 4294967168 }
  0x14   :  { %754 = dma.done.wait [#allocation8], 144  }
  0x15   :  { %755 = vsyncadd [#allocation8], 4294967152 }
  0x16   :  { %756 = dma.done.wait [#allocation11], 1024  }
  0x17   :  { %757 = vsyncadd [#allocation11], 4294966272  ;;  %v545_v0 = vld [vmem:[#allocation9] sm:$0xff]  ;;  %v544_v2 = vld [vmem:[#allocation4] sm:$0xff]  ;;  %vm126_vm0 = vcmask 130048   ;;  %vm144_vm1 = vcmask 523264   ;;  %v155_v11 = vlaneseq }
  0x18   :  { %v549_v1 = vld [vmem:[#allocation10 + $0x18] sm:$0xff]  ;;  %137 = vmatpush.bf16.msra.mxu0 %v545_v0  ;;  %v548_v3 = vld [vmem:[#allocation10 + $0x10] sm:$0xff]  ;;  %v547_v4 = vld [vmem:[#allocation10 + $0x8] sm:$0xff]  ;;  %vm205_vm3 = vcmask 516096   ;;  %vm232_vm4 = vcmask 517121   ;;  %vm259_vm5 = vcmask 518146  }
  0x19   :  { %193 = vmatpush.bf16.msra.mxu1 %v549_v1  ;;  %217 = vmatpush.bf16.msra.mxu2 %v549_v1  ;;  %v546_v5 = vld [vmem:[#allocation10] sm:$0xff]  ;;  %v158_v6 = vld [vmem:[#allocation7] sm:$0x1]  ;;  %v839_v13 = vand.u32 127, %v155_v11  ;;  %vm286_vm6 = vcmask 519171   ;;  %v554_v11 = vld [vmem:[#allocation12 + $0x18] sm:$0xff] }
  0x1a   :  { %244 = vmatpush.bf16.msra.mxu3 %v549_v1  ;;  %v566_v7 = vld [vmem:[%s888_s3] ss:$0 sm:$0xff]  ;;  %vm451_vm7 = vcmask 517120   ;;  %s769_s3 = smov [#allocation14]   ;;  %s473_s10 = sshll.u32 %s893_s8, 4  ;;  %s474_s10 = int_to_ptr.hbm [resolvable:$true] %s473_s10 }
  0x1b   :  { %498 = vmatmul.msk.bf16.vlgmr.msra.gmra.mxu0 %vm126_vm0, %v544_v2  ;;  %vm157_vm2 = vcmp.lt.s32.totalorder %v839_v13, 32  ;;  %s471_s29 = sshll.u32 %s769_s3, 4  ;;  %v567_v13 = vld [vmem:[%s891_s6] ss:$0 sm:$0xff]  ;;  %s770_s13 = smov [#allocation13]   ;;  %s472_s29 = int_to_ptr.vmem [resolvable:$true] %s471_s29 }
  0x1c   :  { %271 = vmatpush.bf16.msrb.mxu0 %v549_v1  ;;  %s457_s14 = sshll.u32 %s770_s13, 4  ;;  %s459_s17 = sshll.u32 %s892_s7, 4  ;;  %s458_s14 = int_to_ptr.vmem [resolvable:$true] %s457_s14  ;;  %s460_s17 = int_to_ptr.hbm [resolvable:$true] %s459_s17 }
  0x1d   :  { %194 = vmatpush.bf16.msra.mxu1 %v548_v3  ;;  %218 = vmatpush.bf16.msra.mxu2 %v548_v3  ;;  %s771_s8 = smov 128   ;;  %s772_s1 = smov 8  }
  0x1e   :  { %245 = vmatpush.bf16.msra.mxu3 %v548_v3 }
  0x20   :  { %272 = vmatpush.bf16.msrb.mxu0 %v548_v3 }
  0x21   :  { %195 = vmatpush.bf16.msra.mxu1 %v547_v4  ;;  %219 = vmatpush.bf16.msra.mxu2 %v547_v4 }
  0x22   :  { %246 = vmatpush.bf16.msra.mxu3 %v547_v4 }
  0x24   :  { %273 = vmatpush.bf16.msrb.mxu0 %v547_v4 }
  0x25   :  { %196 = vmatpush.bf16.msra.mxu1 %v546_v5  ;;  %220 = vmatpush.bf16.msra.mxu2 %v546_v5 }
  0x26   :  { %247 = vmatpush.bf16.msra.mxu3 %v546_v5 }
  0x28   :  { %274 = vmatpush.bf16.msrb.mxu0 %v546_v5  ;;  %515 = vmatmul.msk.bf16.vlgmr.msra.gmra.mxu1 %vm144_vm1, %v158_v6 }
  0x29   :  { %298 = vmatpush.bf16.msrb.mxu1 %v549_v1  ;;  %321 = vmatpush.bf16.msrb.mxu2 %v549_v1 }
  0x2a   :  { %347 = vmatpush.bf16.msrb.mxu3 %v549_v1 }
  0x2c   :  { %373 = vmatpush.bf16.msra.mxu0 %v549_v1 }
  0x2d   :  { %299 = vmatpush.bf16.msrb.mxu1 %v548_v3  ;;  %322 = vmatpush.bf16.msrb.mxu2 %v548_v3 }
  0x2e   :  { %348 = vmatpush.bf16.msrb.mxu3 %v548_v3 }
  0x30   :  { %374 = vmatpush.bf16.msra.mxu0 %v548_v3 }
  0x31   :  { %300 = vmatpush.bf16.msrb.mxu1 %v547_v4  ;;  %323 = vmatpush.bf16.msrb.mxu2 %v547_v4 }
  0x32   :  { %349 = vmatpush.bf16.msrb.mxu3 %v547_v4 }
  0x34   :  { %375 = vmatpush.bf16.msra.mxu0 %v547_v4 }
  0x35   :  { %301 = vmatpush.bf16.msrb.mxu1 %v546_v5  ;;  %324 = vmatpush.bf16.msrb.mxu2 %v546_v5 }
  0x36   :  { %350 = vmatpush.bf16.msrb.mxu3 %v546_v5 }
  0x38   :  { %376 = vmatpush.bf16.msra.mxu0 %v546_v5 }
  0x39   :  { %439 = vmatpush.bf16.msra.mxu1 %v554_v11 }
  0x98   :  { %v139_v8 = vpop.f32.mrf.mxu0 }
  0x99   :  { %v140_v9 = vadd.f32 %v566_v7, %v139_v8 }
  0x9b   :  { %145 = vst.msk [vmem:[#allocation2] sm:$0xff] %vm144_vm1, %v140_v9 }
  0xa0   :  { %v141_v10 = vpop.f32.mrf.mxu0 }
  0xa1   :  { %v142_v12 = vadd.f32 %v566_v7, %v141_v10 }
  0xa2   :  { %v159_v15 = vld [vmem:[#allocation2] sm:$0x3]  ;;  %v207_v23 = vld [vmem:[#allocation2 + $0x2] sm:$0x3]  ;;  %v234_v32 = vld [vmem:[#allocation2 + $0x4] sm:$0x3] }
  0xa3   :  { %146 = vst.msk [vmem:[#allocation2 + $0x8] sm:$0xff] %vm144_vm1, %v142_v12  ;;  %v261_v41 = vld [vmem:[#allocation2 + $0x6] sm:$0x3]  ;;  %v312_v58 = vld [vmem:[#allocation2 + $0x4] sm:$0x3]  ;;  %v553_v12 = vld [vmem:[#allocation12 + $0x10] sm:$0xff] }
  0xa4   :  { %v289_v50 = vld [vmem:[#allocation2 + $0x6] sm:$0x3]  ;;  %v338_v3 = vld [vmem:[#allocation2 + $0x2] sm:$0x3]  ;;  %440 = vmatpush.bf16.msra.mxu1 %v553_v12 }
  0xa5   :  { %v198_v14 = vpop.f32.mrf.mxu1 }
  0xaa   :  { %v160_v16 = vld [vmem:[#allocation2 + $0xe] sm:$0x3]  ;;  %v208_v22 = vld [vmem:[#allocation2 + $0xc] sm:$0x3]  ;;  %v235_v31 = vld [vmem:[#allocation2 + $0xa] sm:$0x3] }
  0xab   :  { %v161_v17 = vsel %vm157_vm2, %v159_v15, %v160_v16  ;;  %v209_v24 = vsel %vm157_vm2, %v207_v23, %v208_v22  ;;  %v236_v33 = vsel %vm157_vm2, %v234_v32, %v235_v31  ;;  %v262_v40 = vld [vmem:[#allocation2 + $0x8] sm:$0x3]  ;;  %v311_v57 = vld [vmem:[#allocation2 + $0xa] sm:$0x3]  ;;  %v337_v2 = vld [vmem:[#allocation2 + $0xc] sm:$0x3] }
  0xac   :  { %v202_v18 = vadd.f32 %v198_v14, %v161_v17  ;;  %v263_v42 = vsel %vm157_vm2, %v261_v41, %v262_v40  ;;  %v288_v49 = vld [vmem:[#allocation2 + $0x8] sm:$0x3]  ;;  %v313_v59 = vsel %vm157_vm2, %v311_v57, %v312_v58  ;;  %v339_v4 = vsel %vm157_vm2, %v337_v2, %v338_v3  ;;  %v552_v14 = vld [vmem:[#allocation12 + $0x8] sm:$0xff]  ;;  %v551_v15 = vld [vmem:[#allocation12] sm:$0xff] }
  0xad   :  { %v200_v19 = vpop.f32.mrf.mxu1  ;;  %v290_v51 = vsel %vm157_vm2, %v288_v49, %v289_v50  ;;  %441 = vmatpush.bf16.msra.mxu1 %v552_v14  ;;  %v363_v16 = vld [vmem:[#allocation2 + $0xe] sm:$0x3]  ;;  %v364_v17 = vld [vmem:[#allocation2] sm:$0x3] }
  0xae   :  { %568 = vtanh.f32 %v202_v18  ;;  %v365_v18 = vsel %vm157_vm2, %v363_v16, %v364_v17 }
  0xb1   :  { %442 = vmatpush.bf16.msra.mxu1 %v551_v15 }
  0xb4   :  { %v569_v20 = vpop.eup %568 }
  0xb5   :  { %v204_v21 = vpack.c.bf16 %v569_v20, %v569_v20 }
  0xb7   :  { %206 = vst.msk [vmem:[#allocation3] sm:$0x1] %vm205_vm3, %v204_v21  ;;  %516 = vmatmul.msk.bf16.vlgmr.msra.gmra.mxu2 %vm144_vm1, %v204_v21 }
 0x13a   :  { %v222_v25 = vpop.f32.mrf.mxu2 }
 0x13b   :  { %v226_v26 = vadd.f32 %v222_v25, %v209_v24 }
 0x13d   :  { %570 = vtanh.f32 %v226_v26 }
 0x142   :  { %v224_v27 = vpop.f32.mrf.mxu2 }
 0x143   :  { %v571_v28 = vpop.eup %570 }
 0x144   :  { %v228_v29 = vpack.c.bf16 %v571_v28, %v571_v28 }
 0x146   :  { %v230_v30 = vrot.slane %v228_v29, 7  ;;  %517 = vmatmul.msk.bf16.vlgmr.msra.gmra.mxu3 %vm144_vm1, %v228_v29 }
 0x148   :  { %233 = vst.msk [vmem:[#allocation3] sm:$0x2] %vm232_vm4, %v230_v30 }
 0x1c9   :  { %v249_v34 = vpop.f32.mrf.mxu3 }
 0x1ca   :  { %v253_v35 = vadd.f32 %v249_v34, %v236_v33 }
 0x1cc   :  { %572 = vtanh.f32 %v253_v35 }
 0x1d1   :  { %v251_v36 = vpop.f32.mrf.mxu3 }
 0x1d2   :  { %v573_v37 = vpop.eup %572 }
 0x1d3   :  { %v255_v38 = vpack.c.bf16 %v573_v37, %v573_v37 }
 0x1d5   :  { %v257_v39 = vrot.slane %v255_v38, 6  ;;  %518 = vmatmul.msk.bf16.vlgmr.msrb.gmra.mxu0 %vm144_vm1, %v255_v38 }
 0x1d7   :  { %260 = vst.msk [vmem:[#allocation3] sm:$0x4] %vm259_vm5, %v257_v39 }
 0x252   :  { %v276_v43 = vpop.f32.mrf.mxu0 }
 0x253   :  { %v280_v44 = vadd.f32 %v276_v43, %v263_v42 }
 0x255   :  { %574 = vtanh.f32 %v280_v44 }
 0x25a   :  { %v278_v45 = vpop.f32.mrf.mxu0 }
 0x25b   :  { %v575_v46 = vpop.eup %574 }
 0x25c   :  { %v282_v47 = vpack.c.bf16 %v575_v46, %v575_v46 }
 0x25e   :  { %v284_v48 = vrot.slane %v282_v47, 5  ;;  %519 = vmatmul.msk.bf16.vlgmr.msrb.gmra.mxu1 %vm144_vm1, %v282_v47 }
 0x260   :  { %287 = vst.msk [vmem:[#allocation3] sm:$0x8] %vm286_vm6, %v284_v48 }
 0x2db   :  { %v303_v52 = vpop.f32.mrf.mxu1 }
 0x2dc   :  { %v307_v53 = vadd.f32 %v303_v52, %v290_v51 }
 0x2de   :  { %576 = vtanh.f32 %v307_v53 }
 0x2e3   :  { %v305_v54 = vpop.f32.mrf.mxu1 }
 0x2e4   :  { %v577_v55 = vpop.eup %576 }
 0x2e5   :  { %v309_v56 = vpack.c.bf16 %v577_v55, %v577_v55 }
 0x2e7   :  { %310 = vst.msk [vmem:[#allocation3 + $0x4] sm:$0x1] %vm205_vm3, %v309_v56  ;;  %520 = vmatmul.msk.bf16.vlgmr.msrb.gmra.mxu2 %vm144_vm1, %v309_v56 }
 0x36a   :  { %v326_v60 = vpop.f32.mrf.mxu2 }
 0x36b   :  { %v330_v61 = vadd.f32 %v326_v60, %v313_v59 }
 0x36d   :  { %578 = vtanh.f32 %v330_v61 }
 0x372   :  { %v328_v62 = vpop.f32.mrf.mxu2 }
 0x373   :  { %v579_v63 = vpop.eup %578 }
 0x374   :  { %v332_v0 = vpack.c.bf16 %v579_v63, %v579_v63 }
 0x376   :  { %v334_v1 = vrot.slane %v332_v0, 7  ;;  %521 = vmatmul.msk.bf16.vlgmr.msrb.gmra.mxu3 %vm144_vm1, %v332_v0 }
 0x378   :  { %336 = vst.msk [vmem:[#allocation3 + $0x4] sm:$0x2] %vm232_vm4, %v334_v1 }
 0x3f9   :  { %v352_v5 = vpop.f32.mrf.mxu3 }
 0x3fa   :  { %v356_v6 = vadd.f32 %v352_v5, %v339_v4 }
 0x3fc   :  { %580 = vtanh.f32 %v356_v6 }
 0x401   :  { %v354_v7 = vpop.f32.mrf.mxu3 }
 0x402   :  { %v581_v8 = vpop.eup %580 }
 0x403   :  { %v358_v9 = vpack.c.bf16 %v581_v8, %v581_v8 }
 0x405   :  { %v360_v10 = vrot.slane %v358_v9, 6  ;;  %522 = vmatmul.msk.bf16.vlgmr.msra.gmra.mxu0 %vm144_vm1, %v358_v9 }
 0x407   :  { %362 = vst.msk [vmem:[#allocation3 + $0x4] sm:$0x4] %vm259_vm5, %v360_v10 }
 0x482   :  { %v378_v19 = vpop.f32.mrf.mxu0 }
 0x483   :  { %v382_v20 = vadd.f32 %v378_v19, %v365_v18 }
 0x485   :  { %582 = vtanh.f32 %v382_v20 }
 0x48a   :  { %v380_v21 = vpop.f32.mrf.mxu0 }
 0x48b   :  { %v583_v22 = vpop.eup %582 }
 0x48c   :  { %v384_v23 = vpack.c.bf16 %v583_v22, %v583_v22  ;;  %452 = vst.msk [vmem:[#allocation14] sm:$0x3] %vm451_vm7, %v583_v22 }
 0x48d   :  { %476 = dma.vmem_to_hbm [thread:$0]  %s472_s29, 32, %s474_s10, [#allocation15]  }
 0x48e   :  { %v386_v24 = vrot.slane %v384_v23, 5 }
 0x490   :  { %388 = vst.msk [vmem:[#allocation3 + $0x4] sm:$0x8] %vm286_vm6, %v386_v24 }
 0x497   :  { %v550_v25 = vld [vmem:[#allocation3] sm:$0xff] }
 0x498   :  { %543 = vmatmul.msk.bf16.vlgmr.msra.gmra.mxu1 %vm144_vm1, %v550_v25 }
 0x515   :  { %v444_v26 = vpop.f32.mrf.mxu1 }
 0x516   :  { %v445_v27 = vadd.f32 %v567_v13, %v444_v26 }
 0x518   :  { %449 = vst.msk [vmem:[#allocation13] sm:$0xff] %vm144_vm1, %v445_v27 }
 0x51d   :  { %v446_v28 = vpop.f32.mrf.mxu1 }
 0x51e   :  { %v447_v29 = vadd.f32 %v567_v13, %v446_v28 }
 0x520   :  { %450 = vst.msk [vmem:[#allocation13 + $0x8] sm:$0xff] %vm144_vm1, %v447_v29 }
 0x521   :  { %465 = dma.vmem_to_hbm [thread:$0]  %s458_s14, 256, %s460_s17, [#allocation6], %s771_s8, %s771_s8, %s772_s1  }
 0x522   :  { %758 = dma.done.wait [#allocation6], 256  }
 0x523   :  { %759 = vsyncadd [#allocation6], 4294967040 }
 0x524   :  { %760 = dma.done.wait [#allocation15], 32  }
 0x525   :  { %761 = vsyncadd [#allocation15], 4294967264 }
 0x526   :  { %485 = vsyncpa [#allocation5], 1 }
 0x527   :  { %486 = vsyncpa [#allocation8], 1 }
 0x528   :  { %487 = vsyncpa [#allocation11], 1 }
 0x529   :  { %488 = vsyncpa [#allocation6], 1 }
 0x52a   :  { %489 = vsyncpa [#allocation15], 1 }

</bundles_post_ra>
